<compile_context>
chip_gen: v7x
topology: tpu7x:2x2x1
jax: 0.10.0
libtpu: 0.0.40
codegen_flags: <defaults>
</compile_context>

<pallas_src>
import functools

import jax
import jax.numpy as jnp
from jax.experimental import pallas as pl
from jax.experimental.pallas import tpu as pltpu

# Logical (PyTorch) dims and TPU-padded dims.
IN_F, HID_F, OUT_F = 4, 50, 3
IN_PAD, HID_PAD, OUT_PAD = 8, 64, 128


def _round_up(a, m):
    return (a + m - 1) // m * m


def mlp_kernel(x_ref, w1_ref, b1_ref, w2_ref, b2_ref, w3_ref, b3_ref, o_ref):
    # lin1 + relu
    h1 = jnp.dot(x_ref[...], w1_ref[...], preferred_element_type=jnp.float32)
    h1 = jnp.maximum(h1 + b1_ref[...], 0.0)
    # lin2 + relu
    h2 = jnp.dot(h1, w2_ref[...], preferred_element_type=jnp.float32)
    h2 = jnp.maximum(h2 + b2_ref[...], 0.0)
    # out (no activation) — lane-dense [tile, 128] store; real output is columns [:3]
    y = jnp.dot(h2, w3_ref[...], preferred_element_type=jnp.float32) + b3_ref[...]
    o_ref[...] = y.astype(o_ref.dtype)


def pad_params(params):
    """Zero-pad weights/biases to TPU-friendly shapes (one-time host cost)."""
    def pad2(a, r, c):
        return jnp.pad(a, ((0, r - a.shape[0]), (0, c - a.shape[1])))

    return {
        "w1": pad2(params["w1"], IN_PAD, HID_PAD),
        "b1": pad2(params["b1"], 1, HID_PAD),
        "w2": pad2(params["w2"], HID_PAD, HID_PAD),
        "b2": pad2(params["b2"], 1, HID_PAD),
        "w3": pad2(params["w3"], HID_PAD, OUT_PAD),
        "b3": pad2(params["b3"], 1, OUT_PAD),
    }


@functools.partial(jax.jit, static_argnames=("batch_tile",))
def net_forward(x, padded_params, *, batch_tile=512):
    """x: [B, 4] float32. padded_params: output of pad_params(). Returns [B, 3] float32."""
    B = x.shape[0]
    p = padded_params

    # Pick a batch tile (multiple of 8 sublanes), pad batch to a multiple of it.
    tb = min(batch_tile, _round_up(B, 8))
    b_pad = _round_up(B, tb)
    x_p = jnp.pad(x, ((0, b_pad - B), (0, IN_PAD - IN_F)))

    grid = (b_pad // tb,)
    const = lambda shape: pl.BlockSpec(shape, lambda i: (0, 0))  # resident across grid

    out = pl.pallas_call(
        mlp_kernel,
        out_shape=jax.ShapeDtypeStruct((b_pad, OUT_PAD), jnp.float32),
        grid=grid,
        in_specs=[
            pl.BlockSpec((tb, IN_PAD), lambda i: (i, 0)),   # x: tiled along batch
            const((IN_PAD, HID_PAD)), const((1, HID_PAD)),  # w1, b1
            const((HID_PAD, HID_PAD)), const((1, HID_PAD)), # w2, b2
            const((HID_PAD, OUT_PAD)), const((1, OUT_PAD)), # w3, b3
        ],
        out_specs=pl.BlockSpec((tb, OUT_PAD), lambda i: (i, 0)),
        compiler_params=pltpu.CompilerParams(
            dimension_semantics=("parallel",),  # megacore sharding on v7x; no-op on v5e/v6e
        ),
    )(x_p, p["w1"], p["b1"], p["w2"], p["b2"], p["w3"], p["b3"])

    return out[:B, :OUT_F]


def init_params(key):
    """Deterministic init mimicking nn.Linear's U(-1/sqrt(fan_in), 1/sqrt(fan_in)).

    Weights stored as [in, out] so the kernel computes x @ W + b (== PyTorch x @ W.T + b).
    """
    def linear(key, fan_in, fan_out):
        kw, kb = jax.random.split(key)
        bound = 1.0 / jnp.sqrt(fan_in)
        w = jax.random.uniform(kw, (fan_in, fan_out), jnp.float32, -bound, bound)
        b = jax.random.uniform(kb, (1, fan_out), jnp.float32, -bound, bound)
        return w, b

    k1, k2, k3 = jax.random.split(key, 3)
    w1, b1 = linear(k1, IN_F, HID_F)
    w2, b2 = linear(k2, HID_F, HID_F)
    w3, b3 = linear(k3, HID_F, OUT_F)
    return {"w1": w1, "b1": b1, "w2": w2, "b2": b2, "w3": w3, "b3": b3}


def net_forward_ref(x, p):
    h1 = jnp.maximum(x @ p["w1"] + p["b1"], 0.0)
    h2 = jnp.maximum(h1 @ p["w2"] + p["b2"], 0.0)
    return h2 @ p["w3"] + p["b3"]


if __name__ == "__main__":
    key = jax.random.PRNGKey(0)
    kx, kp, kx2 = jax.random.split(key, 3)

    params = init_params(kp)
    padded = pad_params(params)

    # Small case (single grid step).
    x = jax.random.normal(kx, (8, IN_F), jnp.float32)
    out = jax.block_until_ready(net_forward(x, padded))
    ref = net_forward_ref(x, params)
    assert out.shape == (8, OUT_F), out.shape
    assert jnp.allclose(out, ref, atol=1e-5, rtol=1e-5), "mismatch vs reference (B=8)"

    # Multi-tile case to exercise the batch grid + padding path (3 grid steps of 128 rows).
    x2 = jax.random.normal(kx2, (300, IN_F), jnp.float32)
    out2 = jax.block_until_ready(net_forward(x2, padded, batch_tile=128))
    ref2 = net_forward_ref(x2, params)
    assert out2.shape == (300, OUT_F), out2.shape
    assert jnp.allclose(out2, ref2, atol=1e-5, rtol=1e-5), "mismatch vs reference (B=300)"

    print("KERNEL_OK")
</pallas_src>

<mosaic_0001>
module attributes {stable_mosaic.version = 11 : i64} {
  func.func @mlp_kernel(%arg0: i32, %arg1: memref<8x8xf32, #tpu.memory_space<vmem>>, %arg2: memref<8x64xf32, #tpu.memory_space<vmem>>, %arg3: memref<1x64xf32, #tpu.memory_space<vmem>>, %arg4: memref<64x64xf32, #tpu.memory_space<vmem>>, %arg5: memref<1x64xf32, #tpu.memory_space<vmem>>, %arg6: memref<64x128xf32, #tpu.memory_space<vmem>>, %arg7: memref<1x128xf32, #tpu.memory_space<vmem>>, %arg8: memref<8x128xf32, #tpu.memory_space<vmem>>) attributes {dimension_semantics = [#tpu.dimension_semantics<parallel>], iteration_bounds = array<i64: 1>, scalar_prefetch = 0 : i64, scratch_operands = 0 : i64, tpu.core_type = #tpu.core_type<tc>, window_params = [{transform_indices = @transform_0, window_bounds = array<i64: 8, 8>}, {pipeline_mode = #tpu.pipeline_mode<synchronous>, transform_indices = @transform_1, window_bounds = array<i64: 8, 64>}, {pipeline_mode = #tpu.pipeline_mode<synchronous>, transform_indices = @transform_2, window_bounds = array<i64: 1, 64>}, {pipeline_mode = #tpu.pipeline_mode<synchronous>, transform_indices = @transform_3, window_bounds = array<i64: 64, 64>}, {pipeline_mode = #tpu.pipeline_mode<synchronous>, transform_indices = @transform_4, window_bounds = array<i64: 1, 64>}, {pipeline_mode = #tpu.pipeline_mode<synchronous>, transform_indices = @transform_5, window_bounds = array<i64: 64, 128>}, {pipeline_mode = #tpu.pipeline_mode<synchronous>, transform_indices = @transform_6, window_bounds = array<i64: 1, 128>}, {transform_indices = @transform_7, window_bounds = array<i64: 8, 128>}]} {
    %c0 = arith.constant 0 : index
    %c0_0 = arith.constant 0 : index
    %0 = vector.load %arg1[%c0, %c0_0] : memref<8x8xf32, #tpu.memory_space<vmem>>, vector<8x8xf32>
    %c0_1 = arith.constant 0 : index
    %c0_2 = arith.constant 0 : index
    %1 = vector.load %arg2[%c0_1, %c0_2] : memref<8x64xf32, #tpu.memory_space<vmem>>, vector<8x64xf32>
    %cst = arith.constant dense<0.000000e+00> : vector<8x64xf32>
    %2 = tpu.matmul %0, %1, %cst {dimension_numbers = #tpu.dot_dimension_numbers<[1], [0], [0], [1], [0, 0, 1, 1], [], []>} : vector<8x8xf32>, vector<8x64xf32>, vector<8x64xf32> -> vector<8x64xf32>
    %c0_3 = arith.constant 0 : index
    %c0_4 = arith.constant 0 : index
    %3 = vector.load %arg3[%c0_3, %c0_4] : memref<1x64xf32, #tpu.memory_space<vmem>>, vector<1x64xf32>
    %4 = vector.broadcast %3 : vector<1x64xf32> to vector<8x64xf32>
    %5 = arith.addf %2, %4 : vector<8x64xf32>
    %cst_5 = arith.constant 0.000000e+00 : f32
    %6 = vector.broadcast %cst_5 : f32 to vector<8x64xf32>
    %7 = arith.maximumf %5, %6 : vector<8x64xf32>
    %c0_6 = arith.constant 0 : index
    %c0_7 = arith.constant 0 : index
    %8 = vector.load %arg4[%c0_6, %c0_7] : memref<64x64xf32, #tpu.memory_space<vmem>>, vector<64x64xf32>
    %cst_8 = arith.constant dense<0.000000e+00> : vector<8x64xf32>
    %9 = tpu.matmul %7, %8, %cst_8 {dimension_numbers = #tpu.dot_dimension_numbers<[1], [0], [0], [1], [0, 0, 1, 1], [], []>} : vector<8x64xf32>, vector<64x64xf32>, vector<8x64xf32> -> vector<8x64xf32>
    %c0_9 = arith.constant 0 : index
    %c0_10 = arith.constant 0 : index
    %10 = vector.load %arg5[%c0_9, %c0_10] : memref<1x64xf32, #tpu.memory_space<vmem>>, vector<1x64xf32>
    %11 = vector.broadcast %10 : vector<1x64xf32> to vector<8x64xf32>
    %12 = arith.addf %9, %11 : vector<8x64xf32>
    %cst_11 = arith.constant 0.000000e+00 : f32
    %13 = vector.broadcast %cst_11 : f32 to vector<8x64xf32>
    %14 = arith.maximumf %12, %13 : vector<8x64xf32>
    %c0_12 = arith.constant 0 : index
    %c0_13 = arith.constant 0 : index
    %15 = vector.load %arg6[%c0_12, %c0_13] : memref<64x128xf32, #tpu.memory_space<vmem>>, vector<64x128xf32>
    %cst_14 = arith.constant dense<0.000000e+00> : vector<8x128xf32>
    %16 = tpu.matmul %14, %15, %cst_14 {dimension_numbers = #tpu.dot_dimension_numbers<[1], [0], [0], [1], [0, 0, 1, 1], [], []>} : vector<8x64xf32>, vector<64x128xf32>, vector<8x128xf32> -> vector<8x128xf32>
    %c0_15 = arith.constant 0 : index
    %c0_16 = arith.constant 0 : index
    %17 = vector.load %arg7[%c0_15, %c0_16] : memref<1x128xf32, #tpu.memory_space<vmem>>, vector<1x128xf32>
    %18 = vector.broadcast %17 : vector<1x128xf32> to vector<8x128xf32>
    %19 = arith.addf %16, %18 : vector<8x128xf32>
    %c0_17 = arith.constant 0 : index
    %c0_18 = arith.constant 0 : index
    %20 = vector.load %arg8[%c0_17, %c0_18] : memref<8x128xf32, #tpu.memory_space<vmem>>, vector<8x128xf32>
    tpu.vector_store %arg8[%c0_17, %c0_18], %19 {strides = array<i32>} : memref<8x128xf32, #tpu.memory_space<vmem>>, vector<8x128xf32>,
    return
  }
  func.func @transform_0(%arg0: i32) -> (i32, i32) {
    %c0_i32 = arith.constant 0 : i32
    %c0_i32_0 = arith.constant 0 : i32
    return %arg0, %c0_i32 : i32, i32
  }
  func.func @transform_1(%arg0: i32) -> (i32, i32) {
    %c0_i32 = arith.constant 0 : i32
    %c0_i32_0 = arith.constant 0 : i32
    %c0_i32_1 = arith.constant 0 : i32
    return %c0_i32, %c0_i32_0 : i32, i32
  }
  func.func @transform_2(%arg0: i32) -> (i32, i32) {
    %c0_i32 = arith.constant 0 : i32
    %c0_i32_0 = arith.constant 0 : i32
    %c0_i32_1 = arith.constant 0 : i32
    return %c0_i32, %c0_i32_0 : i32, i32
  }
  func.func @transform_3(%arg0: i32) -> (i32, i32) {
    %c0_i32 = arith.constant 0 : i32
    %c0_i32_0 = arith.constant 0 : i32
    %c0_i32_1 = arith.constant 0 : i32
    return %c0_i32, %c0_i32_0 : i32, i32
  }
  func.func @transform_4(%arg0: i32) -> (i32, i32) {
    %c0_i32 = arith.constant 0 : i32
    %c0_i32_0 = arith.constant 0 : i32
    %c0_i32_1 = arith.constant 0 : i32
    return %c0_i32, %c0_i32_0 : i32, i32
  }
  func.func @transform_5(%arg0: i32) -> (i32, i32) {
    %c0_i32 = arith.constant 0 : i32
    %c0_i32_0 = arith.constant 0 : i32
    %c0_i32_1 = arith.constant 0 : i32
    return %c0_i32, %c0_i32_0 : i32, i32
  }
  func.func @transform_6(%arg0: i32) -> (i32, i32) {
    %c0_i32 = arith.constant 0 : i32
    %c0_i32_0 = arith.constant 0 : i32
    %c0_i32_1 = arith.constant 0 : i32
    return %c0_i32, %c0_i32_0 : i32, i32
  }
  func.func @transform_7(%arg0: i32) -> (i32, i32) {
    %c0_i32 = arith.constant 0 : i32
    %c0_i32_0 = arith.constant 0 : i32
    return %arg0, %c0_i32 : i32, i32
  }
}

</mosaic_0001>

<bundles_post_ra>
// kernel: net_forward.1
= control target key start
LH: loop header
LB: loop body
LE: loop exit
PB: predicated region body
PF: predicated region fallthrough
CT: control target
= control target key end

     0   :  { %12 = vsyncpa [#allocation3], 0  ;;  %s563_s0 = inlined_call_operand.vmem [shape: f32[8,8], index: 0, kind: input, shape index: {}]   ;;  %s564_s1 = inlined_call_operand.vmem [shape: f32[8,64], index: 1, kind: input, shape index: {}]   ;;  %s565_s2 = inlined_call_operand.vmem [shape: f32[1,64], index: 2, kind: input, shape index: {}]   ;;  %s566_s3 = inlined_call_operand.hbm [shape: f32[64,64], index: 3, kind: input, shape index: {}]   ;;  %s567_s4 = inlined_call_operand.vmem [shape: f32[1,64], index: 4, kind: input, shape index: {}]   ;;  %s568_s5 = inlined_call_operand.hbm [shape: f32[64,128], index: 5, kind: input, shape index: {}]   ;;  %s569_s6 = inlined_call_operand.vmem [shape: f32[1,128], index: 6, kind: input, shape index: {}]   ;;  %s570_s7 = inlined_call_operand.vmem [shape: f32[8,128], index: 7, kind: output, shape index: {}]  }
   0x1   :  { %13 = vsyncpa [#allocation5], 0  ;;  %s471_s24 = smov [#allocation2]   ;;  %s423_s28 = scalar_lea.hbm %s566_s3, 1024 }
   0x2   :  { %s25_s25 = sshll.u32 %s471_s24, 4  ;;  %p424_p0 = scmp.ne.s32.totalorder %s566_s3, %s423_s28  ;;  %s26_s25 = int_to_ptr.vmem [resolvable:$true] %s25_s25 }
   0x3   :  { %p427_p1 = scmp.lt.u32.totalorder %s423_s28, %s566_s3 }
   0x5   :  { %p429_p2 = pnand %p427_p1, %p424_p0 }
   0x7   :  { %432 = shalt.err (!%p429_p2)
}
   0x8   :  { %s433_s10 = scalar_lea.vmem %s26_s25, 1024  ;;  %p438_p4 = scmp.lt.s32.totalorder %s26_s25, %s26_s25 }
   0x9   :  { %p434_p3 = scmp.ne.s32.totalorder %s26_s25, %s433_s10  ;;  %p439_p5 = scmp.lt.s32.totalorder %s433_s10, %s433_s10 }
   0xb   :  { %p440_p6 = por %p439_p5, %p438_p4 }
   0xd   :  { %p441_p7 = pnand %p440_p6, %p434_p3 }
   0xf   :  { %444 = shalt.err (!%p441_p7)
}
  0x10   :  { %s472_s11 = smov 128   ;;  %s473_s12 = smov 8  }
  0x11   :  { %31 = dma.hbm_to_vmem [thread:$0]  %s566_s3, 1024, %s26_s25, [#allocation3], %s472_s11, %s472_s11, %s473_s12  }
  0x12   :  { %s474_s15 = smov [#allocation4]   ;;  %s445_s19 = scalar_lea.hbm %s568_s5, 1024 }
  0x13   :  { %s39_s16 = sshll.u32 %s474_s15, 4  ;;  %p446_p8 = scmp.ne.s32.totalorder %s568_s5, %s445_s19  ;;  %s40_s16 = int_to_ptr.vmem [resolvable:$true] %s39_s16 }
  0x14   :  { %p449_p9 = scmp.lt.u32.totalorder %s445_s19, %s568_s5 }
  0x16   :  { %p451_p10 = pnand %p449_p9, %p446_p8 }
  0x18   :  { %454 = shalt.err (!%p451_p10)
}
  0x19   :  { %s455_s24 = scalar_lea.vmem %s40_s16, 1024  ;;  %p460_p12 = scmp.lt.s32.totalorder %s40_s16, %s40_s16 }
  0x1a   :  { %p456_p11 = scmp.ne.s32.totalorder %s40_s16, %s455_s24  ;;  %p461_p13 = scmp.lt.s32.totalorder %s455_s24, %s455_s24 }
  0x1c   :  { %p462_p0 = por %p461_p13, %p460_p12 }
  0x1e   :  { %p463_p1 = pnand %p462_p0, %p456_p11 }
  0x20   :  { %466 = shalt.err (!%p463_p1)
}
  0x21   :  { %45 = dma.hbm_to_vmem [thread:$0]  %s568_s5, 1024, %s40_s16, [#allocation5], %s472_s11, %s472_s11, %s473_s12  }
  0x22   :  { %467 = dma.done.wait [#allocation3], 1024  }
  0x23   :  { %468 = vsyncadd [#allocation3], 4294966272 }
  0x24   :  { %469 = dma.done.wait [#allocation5], 1024  }
  0x25   :  { %470 = vsyncadd [#allocation5], 4294966272  ;;  %v475_v0 = vmov 0.0   ;;  %vm476_vm0 = vmmov 0   ;;  %v477_v1 = vmov 0.0|0.0   ;;  %vm63_vm1 = vcmask 64512  }
  0x26   :  { %349 = vmatprep.subr.mxu0 %v475_v0  ;;  %351 = vmatprep.mubr.msk.f32.mxu0 %vm476_vm0, %v475_v0  ;;  %v55_v2 = vld [vmem:[%s564_s1] sm:$0xff]  ;;  %v139_v5 = vld [vmem:[#allocation2 + $0x8] sm:$0xff]  ;;  %v140_v6 = vld [vmem:[#allocation2 + $0x10] sm:$0xff]  ;;  %vm153_vm2 = vcmask 523264  }
  0x27   :  { %392 = vmatprep.subr.bf16.mxu1 %v477_v1  ;;  %370 = vmatprep.mubr.msk.f32.mxu1 %vm476_vm0, %v475_v0  ;;  %v54_v3 = vld [vmem:[%s563_s0] sm:$0xff]  ;;  %v141_v7 = vld [vmem:[#allocation2 + $0x18] sm:$0xff]  ;;  %v143_v11 = vld [vmem:[#allocation2 + $0x28] sm:$0xff] }
  0x28   :  { %v138_v4 = vld [vmem:[#allocation2] sm:$0xff]  ;;  %350 = vmatpush3.msra.mxu0 %v55_v2  ;;  %v396_v9 = vpack.c.bf16 %v141_v7, %v140_v6  ;;  %v144_v13 = vld [vmem:[#allocation2 + $0x30] sm:$0xff]  ;;  %v145_v14 = vld [vmem:[#allocation2 + $0x38] sm:$0xff] }
  0x29   :  { %352 = vmatmul.mubr.msk.f32.vlgmr.msra.gmra.mrb[0].mxu0 %vm63_vm1, %v54_v3  ;;  %v393_v8 = vpack.c.bf16 %v139_v5, %v138_v4  ;;  %404 = vmatprep.subr.bf16.mxu0 %v477_v1  ;;  %v142_v10 = vld [vmem:[#allocation2 + $0x20] sm:$0xff]  ;;  %v402_v15 = vpack.c.bf16 %v145_v14, %v144_v13  ;;  %v229_v17 = vld [vmem:[#allocation4 + $0x8] sm:$0xff]  ;;  %v230_v18 = vld [vmem:[#allocation4 + $0x10] sm:$0xff] }
  0x2a   :  { %389 = vmatprep.mubr.msk.f32.mxu0 %vm476_vm0, %v475_v0  ;;  %v399_v12 = vpack.c.bf16 %v143_v11, %v142_v10  ;;  %v228_v16 = vld [vmem:[#allocation4] sm:$0xff]  ;;  %v231_v20 = vld [vmem:[#allocation4 + $0x18] sm:$0xff]  ;;  %v233_v23 = vld [vmem:[#allocation4 + $0x28] sm:$0xff] }
  0x2b   :  { %394 = vmatpush3.bf16.msra.mxu1 %v393_v8  ;;  %v405_v19 = vpack.c.bf16 %v229_v17, %v228_v16  ;;  %v408_v21 = vpack.c.bf16 %v231_v20, %v230_v18  ;;  %v232_v22 = vld [vmem:[#allocation4 + $0x20] sm:$0xff]  ;;  %v234_v30 = vld [vmem:[#allocation4 + $0x30] sm:$0xff]  ;;  %v235_v31 = vld [vmem:[#allocation4 + $0x38] sm:$0xff] }
  0x2c   :  { %395 = vmatprep.subr.bf16.mxu1 %v477_v1  ;;  %v411_v24 = vpack.c.bf16 %v233_v23, %v232_v22  ;;  %v323_v25 = vld [vmem:[%s565_s2] ss:$0 sm:$0xff]  ;;  %v414_v32 = vpack.c.bf16 %v235_v31, %v234_v30 }
  0x2d   :  { %406 = vmatpush3.bf16.msra.mxu0 %v405_v19  ;;  %v325_v33 = vld [vmem:[%s567_s4] ss:$0 sm:$0xff] }
  0x2e   :  { %407 = vmatprep.subr.bf16.mxu0 %v477_v1  ;;  %v327_v38 = vld [vmem:[%s569_s6] ss:$0 sm:$0xff] }
  0x2f   :  { %397 = vmatpush3.bf16.msra.mxu1 %v396_v9 }
  0x30   :  { %398 = vmatprep.subr.bf16.mxu1 %v477_v1 }
  0x31   :  { %409 = vmatpush3.bf16.msra.mxu0 %v408_v21 }
  0x32   :  { %410 = vmatprep.subr.bf16.mxu0 %v477_v1 }
  0x33   :  { %400 = vmatpush3.bf16.msra.mxu1 %v399_v12 }
  0x34   :  { %401 = vmatprep.subr.bf16.mxu1 %v477_v1 }
  0x35   :  { %412 = vmatpush3.bf16.msra.mxu0 %v411_v24 }
  0x36   :  { %413 = vmatprep.subr.bf16.mxu0 %v477_v1 }
  0x37   :  { %403 = vmatpush3.bf16.msra.mxu1 %v402_v15 }
  0x39   :  { %415 = vmatpush3.bf16.msra.mxu0 %v414_v32 }
  0xfc   :  { %v133_v26 = vpop.f32.mrb[0].mxu0 }
  0xfd   :  { %v134_v27 = vadd.f32 %v323_v25, %v133_v26  ;;  %v353_v28 = vpop.f32.mrb[1].mxu0 }
  0xff   :  { %v137_v29 = vmax.f32 %v134_v27, 0.0 }
 0x101   :  { %371 = vmatmul.mubr.msk.f32.vlgmr.msra.gmra.mrb[0].mxu1 %vm153_vm2, %v137_v29 }
 0x1d4   :  { %v223_v34 = vpop.f32.mrb[0].mxu1 }
 0x1d5   :  { %v224_v35 = vadd.f32 %v325_v33, %v223_v34  ;;  %v372_v36 = vpop.f32.mrb[1].mxu1 }
 0x1d7   :  { %v227_v37 = vmax.f32 %v224_v35, 0.0 }
 0x1d9   :  { %390 = vmatmul.mubr.msk.f32.vlgmr.msra.gmra.mrb[2].mxu0 %vm153_vm2, %v227_v37 }
 0x2ac   :  { %v312_v39 = vpop.f32.mrb[2].mxu0 }
 0x2ad   :  { %v313_v40 = vadd.f32 %v327_v38, %v312_v39  ;;  %v391_v41 = vpop.f32.mrb[3].mxu0 }
 0x2af   :  { %316 = vst [vmem:[%s570_s7] sm:$0xff] %v313_v40 }
 0x2b0   :  { %321 = vsyncpa [#allocation3], 1 }
 0x2b1   :  { %322 = vsyncpa [#allocation5], 1 }

</bundles_post_ra>
